<compile_context>
chip_gen: v7x
topology: tpu7x:2x2x1
jax: 0.10.0
libtpu: 0.0.40
codegen_flags: <defaults>
</compile_context>

<pallas_src>
import math

import jax
import jax.numpy as jnp
from jax.experimental import pallas as pl
from jax.experimental.pallas import tpu as pltpu


def _spp_v1_kernel(xp_ref, w1_ref, b1_ref, w2_ref, b2_ref, o_ref, y1_ref):
    # Per grid step (b, i, j):
    #   xp_ref : (1, TM, C)   bf16  pooled input tokens (AvgPool2d(2) of x)
    #   w1_ref : (C, OUC)     bf16  resident (constant index map)
    #   b1_ref : (1, OUC)     f32   resident
    #   w2_ref : (OUC, TN)    bf16  streamed along the N grid axis j
    #   b2_ref : (1, TN)      f32
    #   o_ref  : (1, TM, TN)  output tile
    #   y1_ref : (TM, OUC)    f32 scratch: linear_1 output, reused across j
    j = pl.program_id(2)

    @pl.when(j == 0)
    def _compute_linear1():
        # linear_1 on the pooled tokens (== AvgPool2d of linear_1(x), since
        # mean_k(x_k @ W1 + b1) == mean_k(x_k) @ W1 + b1).
        y1_ref[...] = (
            jnp.dot(xp_ref[0], w1_ref[...], preferred_element_type=jnp.float32)
            + b1_ref[...]
        )

    # linear_2 against the current W2 N-tile.
    out = (
        jnp.dot(y1_ref[...].astype(w2_ref.dtype), w2_ref[...],
                preferred_element_type=jnp.float32)
        + b2_ref[...]
    )
    o_ref[0] = out.astype(o_ref.dtype)


def spp_forward(x, w1, b1, w2, b2, *, projector_type="v1",
                compute_dtype=jnp.bfloat16, tn=None, split_m=False):
    """Pallas SPP projector forward (the default 'v1' path of the module).

    x  : (B, T, inc) with T = h*h a perfect square (odd h floors like AvgPool2d)
    w1 : (inc, ouc)  -- transposed PyTorch linear_1.weight
    b1 : (ouc,)
    w2 : (ouc, ouc)  -- transposed PyTorch linear_2.weight
    b2 : (ouc,)
    tn : W2 output-tile width (None -> auto).  split_m: add a second parallel
         grid axis over pooled rows (intended for v7x megacore when B == 1).
    returns (B, (h//2)**2, ouc) in x.dtype
    """
    if "v1" not in projector_type:
        # TODO(synk): 'v2'/'v3' branches (linear_0, different order) not implemented.
        raise NotImplementedError("only the default 'v1' projector_type is implemented")

    B, T, C = x.shape
    h = int(math.isqrt(T))
    assert h * h == T and h >= 2, "num_tokens must be a perfect square >= 4"
    h2 = h // 2
    t4 = h2 * h2
    ouc = w1.shape[1]
    out_dtype = x.dtype

    # ---- W2 output (N) tiling: stream W2 instead of keeping it resident ----
    if tn is None:
        tn = ouc
        for cand in (512, 256, 128):
            if ouc % cand == 0:
                tn = cand
                break
    assert tn == ouc or (ouc % tn == 0 and tn % 128 == 0), "bad tn"
    nj = ouc // tn

    # ---- optional M split (parallel axis beyond batch, for v7x megacore) ----
    if split_m and t4 % 16 == 0:     # t4//2 must stay a multiple of 8
        tm = t4 // 2
    else:
        tm = t4
    mi = t4 // tm

    # ---- AvgPool2d(kernel_size=2) applied to the *input* tokens (exact, by
    #      linearity of linear_1).  Odd h floors, like nn.AvgPool2d.
    xg = x.reshape(B, h, h, C)
    if h % 2:
        xg = xg[:, : 2 * h2, : 2 * h2, :]
    x_pooled = xg.reshape(B, h2, 2, h2, 2, C).mean(axis=(2, 4)).reshape(B, t4, C)

    # bf16 operands for MXU-native throughput / half the weight HBM traffic.
    xp = x_pooled.astype(compute_dtype)
    w1c = w1.astype(compute_dtype)
    w2c = w2.astype(compute_dtype)
    b1r = b1.reshape(1, ouc).astype(jnp.float32)
    b2r = b2.reshape(1, ouc).astype(jnp.float32)

    cbytes = jnp.dtype(compute_dtype).itemsize
    obytes = jnp.dtype(out_dtype).itemsize
    # Explicit scoped-VMEM budget: double-buffered blocks + resident W1/b1 +
    # the persistent linear_1 scratch, with headroom.
    vmem_bytes = (
        2 * tm * C * cbytes          # xp block
        + 2 * C * ouc * cbytes       # W1 (assume 2 buffers even though resident)
        + 2 * ouc * 4                # b1
        + 2 * ouc * tn * cbytes      # W2 tile
        + 2 * tn * 4                 # b2
        + 2 * tm * tn * obytes       # out block
        + tm * ouc * 4               # y1 scratch (f32)
    )
    vmem_limit = int(min(max(int(vmem_bytes * 1.25) + (2 << 20), 32 << 20), 128 << 20))

    cost = pl.CostEstimate(
        flops=2 * B * t4 * C * ouc + 2 * B * t4 * ouc * ouc,
        transcendentals=0,
        bytes_accessed=int(
            B * t4 * C * cbytes                 # pooled activations in
            + C * ouc * cbytes                  # W1 (read once, resident)
            + ouc * ouc * cbytes * mi           # W2 streamed (per M tile)
            + ouc * 4 + ouc * 4                 # biases
            + B * t4 * ouc * obytes             # output
        ),
    )

    return pl.pallas_call(
        _spp_v1_kernel,
        out_shape=jax.ShapeDtypeStruct((B, t4, ouc), out_dtype),
        grid=(B, mi, nj),
        in_specs=[
            pl.BlockSpec((1, tm, C), lambda b, i, j: (b, i, 0)),   # pooled x
            pl.BlockSpec((C, ouc), lambda b, i, j: (0, 0)),        # W1 resident
            pl.BlockSpec((1, ouc), lambda b, i, j: (0, 0)),        # b1 resident
            pl.BlockSpec((ouc, tn), lambda b, i, j: (0, j)),       # W2 N-tile
            pl.BlockSpec((1, tn), lambda b, i, j: (0, j)),         # b2 N-tile
        ],
        out_specs=pl.BlockSpec((1, tm, tn), lambda b, i, j: (b, i, j)),
        scratch_shapes=[pltpu.VMEM((tm, ouc), jnp.float32)],       # y1 persists over j
        compiler_params=pltpu.CompilerParams(
            dimension_semantics=("parallel", "parallel", "arbitrary"),
            vmem_limit_bytes=vmem_limit,
        ),
        cost_estimate=cost,
    )(xp, w1c, b1r, w2c, b2r)


def _spp_v1_reference(x, w1, b1, w2, b2, compute_dtype=None):
    """Pure-JAX mirror of the PyTorch v1 forward (optionally mixed precision)."""
    B, T, C = x.shape
    h = int(math.isqrt(T))
    h2 = h // 2
    if compute_dtype is not None:
        xc, w1c, w2c = (x.astype(compute_dtype), w1.astype(compute_dtype),
                        w2.astype(compute_dtype))
    else:
        xc, w1c, w2c = x, w1, w2
    y = jnp.dot(xc, w1c, preferred_element_type=jnp.float32) + b1      # linear_1
    y = jnp.transpose(y, (0, 2, 1)).reshape(B, -1, h, h)               # (B, ouc, h, h)
    y = y[:, :, : 2 * h2, : 2 * h2]                                    # AvgPool2d floor
    y = y.reshape(B, y.shape[1], h2, 2, h2, 2).mean(axis=(3, 5))       # AvgPool2d(2)
    y = jnp.transpose(y.reshape(B, y.shape[1], -1), (0, 2, 1))         # (B, t4, ouc)
    if compute_dtype is not None:
        y = y.astype(compute_dtype)
    out = jnp.dot(y, w2c, preferred_element_type=jnp.float32) + b2     # linear_2
    return out.astype(x.dtype)


if __name__ == "__main__":
    def run_case(B, num_tokens, inc, ouc, tn, split_m, key):
        k_x, k_w1, k_b1, k_w2, k_b2 = jax.random.split(key, 5)
        x = jax.random.normal(k_x, (B, num_tokens, inc), dtype=jnp.float32)
        w1 = jax.random.normal(k_w1, (inc, ouc), dtype=jnp.float32) * 0.05
        b1 = jax.random.normal(k_b1, (ouc,), dtype=jnp.float32) * 0.05
        w2 = jax.random.normal(k_w2, (ouc, ouc), dtype=jnp.float32) * 0.05
        b2 = jax.random.normal(k_b2, (ouc,), dtype=jnp.float32) * 0.05

        y = spp_forward(x, w1, b1, w2, b2, tn=tn, split_m=split_m)
        y = jax.block_until_ready(y)

        h = int(math.isqrt(num_tokens))
        t4 = (h // 2) ** 2
        assert y.shape == (B, t4, ouc), y.shape
        assert y.dtype == x.dtype, (y.dtype, x.dtype)

        # Tight check vs. a mixed-precision (bf16 operands, f32 accum) mirror.
        y_mix = _spp_v1_reference(x, w1, b1, w2, b2, compute_dtype=jnp.bfloat16)
        err_mix = float(jnp.max(jnp.abs(y - y_mix)))
        assert jnp.allclose(y, y_mix, atol=2e-2, rtol=2e-2), err_mix

        # Loose sanity check vs. the pure-f32 PyTorch-equivalent forward.
        y_f32 = _spp_v1_reference(x, w1, b1, w2, b2)
        err_f32 = float(jnp.max(jnp.abs(y - y_f32)))
        assert jnp.allclose(y, y_f32, atol=1e-1, rtol=1e-1), err_f32

    key = jax.random.PRNGKey(0)
    keys = jax.random.split(key, 3)
    # 1) batch=2, 4x4 token grid, ouc=256 tiled as 2 x 128 -> exercises the
    #    streamed-W2 path and the persistent linear_1 scratch across N tiles.
    run_case(2, 16, 32, 256, 128, False, keys[0])
    # 2) batch=1, 8x8 grid, M split in two -> exercises the extra parallel
    #    grid axis intended for the v7x megacore.
    run_case(1, 64, 32, 256, 128, True, keys[1])
    # 3) odd 5x5 token grid -> AvgPool2d(2) flooring behaviour.
    run_case(1, 25, 32, 256, None, False, keys[2])

    print("KERNEL_OK")
</pallas_src>

<mosaic_0001>
module attributes {stable_mosaic.version = 11 : i64} {
  func.func @_spp_v1_kernel(%arg0: i32, %arg1: i32, %arg2: i32, %arg3: memref<1x4x32xbf16, #tpu.memory_space<vmem>>, %arg4: memref<32x256xbf16, #tpu.memory_space<vmem>>, %arg5: memref<1x256xf32, #tpu.memory_space<vmem>>, %arg6: memref<256x128xbf16, #tpu.memory_space<vmem>>, %arg7: memref<1x128xf32, #tpu.memory_space<vmem>>, %arg8: memref<1x4x128xf32, #tpu.memory_space<vmem>>, %arg9: memref<4x256xf32, #tpu.memory_space<vmem>>) attributes {dimension_semantics = [#tpu.dimension_semantics<parallel>, #tpu.dimension_semantics<parallel>, #tpu.dimension_semantics<arbitrary>], iteration_bounds = array<i64: 2, 1, 2>, scalar_prefetch = 0 : i64, scratch_operands = 1 : i64, tpu.core_type = #tpu.core_type<tc>, window_params = [{transform_indices = @transform_0, window_bounds = array<i64: 1, 4, 32>}, {pipeline_mode = #tpu.pipeline_mode<synchronous>, transform_indices = @transform_1, window_bounds = array<i64: 32, 256>}, {pipeline_mode = #tpu.pipeline_mode<synchronous>, transform_indices = @transform_2, window_bounds = array<i64: 1, 256>}, {transform_indices = @transform_3, window_bounds = array<i64: 256, 128>}, {transform_indices = @transform_4, window_bounds = array<i64: 1, 128>}, {transform_indices = @transform_5, window_bounds = array<i64: 1, 4, 128>}]} {
    %c0_i32 = arith.constant 0 : i32
    %0 = arith.cmpi eq, %arg2, %c0_i32 : i32
    %1 = arith.extui %0 : i1 to i32
    %c0_i32_0 = arith.constant 0 : i32
    %2 = arith.cmpi ne, %1, %c0_i32_0 : i32
    scf.if %2 {
      %c0_9 = arith.constant 0 : index
      %c0_10 = arith.constant 0 : index
      %c0_11 = arith.constant 0 : index
      %13 = vector.load %arg3[%c0_9, %c0_10, %c0_11] : memref<1x4x32xbf16, #tpu.memory_space<vmem>>, vector<1x4x32xbf16>
      %14 = vector.shape_cast %13 : vector<1x4x32xbf16> to vector<4x32xbf16>
      %c0_12 = arith.constant 0 : index
      %c0_13 = arith.constant 0 : index
      %15 = vector.load %arg4[%c0_12, %c0_13] : memref<32x256xbf16, #tpu.memory_space<vmem>>, vector<32x256xbf16>
      %cst_14 = arith.constant dense<0.000000e+00> : vector<4x256xf32>
      %16 = tpu.matmul %14, %15, %cst_14 {dimension_numbers = #tpu.dot_dimension_numbers<[1], [0], [0], [1], [0, 0, 1, 1], [], []>} : vector<4x32xbf16>, vector<32x256xbf16>, vector<4x256xf32> -> vector<4x256xf32>
      %c0_15 = arith.constant 0 : index
      %c0_16 = arith.constant 0 : index
      %17 = vector.load %arg5[%c0_15, %c0_16] : memref<1x256xf32, #tpu.memory_space<vmem>>, vector<1x256xf32>
      %18 = vector.broadcast %17 : vector<1x256xf32> to vector<4x256xf32>
      %19 = arith.addf %16, %18 : vector<4x256xf32>
      %c0_17 = arith.constant 0 : index
      %c0_18 = arith.constant 0 : index
      %20 = vector.load %arg9[%c0_17, %c0_18] : memref<4x256xf32, #tpu.memory_space<vmem>>, vector<4x256xf32>
      tpu.vector_store %arg9[%c0_17, %c0_18], %19 {strides = array<i32>} : memref<4x256xf32, #tpu.memory_space<vmem>>, vector<4x256xf32>,
    } else {
    }
    %c0 = arith.constant 0 : index
    %c0_1 = arith.constant 0 : index
    %3 = vector.load %arg9[%c0, %c0_1] : memref<4x256xf32, #tpu.memory_space<vmem>>, vector<4x256xf32>
    %4 = arith.truncf %3 : vector<4x256xf32> to vector<4x256xbf16>
    %c0_2 = arith.constant 0 : index
    %c0_3 = arith.constant 0 : index
    %5 = vector.load %arg6[%c0_2, %c0_3] : memref<256x128xbf16, #tpu.memory_space<vmem>>, vector<256x128xbf16>
    %cst = arith.constant dense<0.000000e+00> : vector<4x128xf32>
    %6 = tpu.matmul %4, %5, %cst {dimension_numbers = #tpu.dot_dimension_numbers<[1], [0], [0], [1], [0, 0, 1, 1], [], []>} : vector<4x256xbf16>, vector<256x128xbf16>, vector<4x128xf32> -> vector<4x128xf32>
    %c0_4 = arith.constant 0 : index
    %c0_5 = arith.constant 0 : index
    %7 = vector.load %arg7[%c0_4, %c0_5] : memref<1x128xf32, #tpu.memory_space<vmem>>, vector<1x128xf32>
    %8 = vector.broadcast %7 : vector<1x128xf32> to vector<4x128xf32>
    %9 = arith.addf %6, %8 : vector<4x128xf32>
    %c0_6 = arith.constant 0 : index
    %c0_7 = arith.constant 0 : index
    %c0_8 = arith.constant 0 : index
    %10 = vector.load %arg8[%c0_6, %c0_7, %c0_8] : memref<1x4x128xf32, #tpu.memory_space<vmem>>, vector<1x4x128xf32>
    %11 = vector.shape_cast %10 : vector<1x4x128xf32> to vector<4x128xf32>
    %12 = vector.shape_cast %9 : vector<4x128xf32> to vector<1x4x128xf32>
    tpu.vector_store %arg8[%c0_6, %c0_7, %c0_8], %12 {strides = array<i32>} : memref<1x4x128xf32, #tpu.memory_space<vmem>>, vector<1x4x128xf32>,
    return
  }
  func.func @transform_0(%arg0: i32, %arg1: i32, %arg2: i32) -> (i32, i32, i32) {
    %c0_i32 = arith.constant 0 : i32
    %c0_i32_0 = arith.constant 0 : i32
    return %arg0, %arg1, %c0_i32 : i32, i32, i32
  }
  func.func @transform_1(%arg0: i32, %arg1: i32, %arg2: i32) -> (i32, i32) {
    %c0_i32 = arith.constant 0 : i32
    %c0_i32_0 = arith.constant 0 : i32
    %c0_i32_1 = arith.constant 0 : i32
    return %c0_i32, %c0_i32_0 : i32, i32
  }
  func.func @transform_2(%arg0: i32, %arg1: i32, %arg2: i32) -> (i32, i32) {
    %c0_i32 = arith.constant 0 : i32
    %c0_i32_0 = arith.constant 0 : i32
    %c0_i32_1 = arith.constant 0 : i32
    return %c0_i32, %c0_i32_0 : i32, i32
  }
  func.func @transform_3(%arg0: i32, %arg1: i32, %arg2: i32) -> (i32, i32) {
    %c0_i32 = arith.constant 0 : i32
    %c0_i32_0 = arith.constant 0 : i32
    return %c0_i32, %arg2 : i32, i32
  }
  func.func @transform_4(%arg0: i32, %arg1: i32, %arg2: i32) -> (i32, i32) {
    %c0_i32 = arith.constant 0 : i32
    %c0_i32_0 = arith.constant 0 : i32
    return %c0_i32, %arg2 : i32, i32
  }
  func.func @transform_5(%arg0: i32, %arg1: i32, %arg2: i32) -> (i32, i32, i32) {
    %c0_i32 = arith.constant 0 : i32
    return %arg0, %arg1, %arg2 : i32, i32, i32
  }
}

</mosaic_0001>

<bundles_post_ra>
// kernel: tpu_custom_call.1
= control target key start
LH: loop header
LB: loop body
LE: loop exit
PB: predicated region body
PF: predicated region fallthrough
CT: control target
= control target key end

     0   :  { %s1693_s0 = inlined_call_operand.hbm [shape: bf16[2,4,32], index: 0, kind: input, shape index: {}]   ;;  %s1694_s1 = inlined_call_operand.hbm [shape: bf16[32,256], index: 1, kind: input, shape index: {}]   ;;  %s1695_s2 = inlined_call_operand.vmem [shape: f32[1,256], index: 2, kind: input, shape index: {}]   ;;  %s1696_s3 = inlined_call_operand.hbm [shape: bf16[256,256], index: 3, kind: input, shape index: {}]   ;;  %s1697_s4 = inlined_call_operand.vmem [shape: f32[1,256], index: 4, kind: input, shape index: {}]   ;;  %s1698_s5 = inlined_call_operand.hbm [shape: f32[2,4,256], index: 5, kind: output, shape index: {}]  }
   0x1   :  { %1714 = sst [smem:[#allocation26_spill]] %s1693_s0 }
   0x2   :  { %1715 = sst [smem:[#allocation27_spill]] %s1695_s2 }
   0x3   :  { %1716 = sst [smem:[#allocation28_spill]] %s1697_s4 }
   0x4   :  { %1717 = sst [smem:[#allocation29_spill]] %s1698_s5 }
   0x5   :  { %10 = vsyncpa [#allocation4], 0 }
   0x6   :  { %12 = vsyncpa [#allocation4 + $0x1], 0 }
   0x7   :  { %13 = vsyncpa [#allocation7], 0 }
   0x8   :  { %14 = vsyncpa [#allocation5], 0 }
   0x9   :  { %16 = vsyncpa [#allocation5 + $0x1], 0  ;;  %s1268_s18 = smov 0   ;;  %s1270_s19 = smov 0  }
   0xa   :  { %s1272_s20 = smov 0   ;;  %s1274_s21 = smov 0  }
   0xb   :  { %s1276_s22 = smov 0   ;;  %s1278_s23 = smov 0  }
   0xc   :  { %s1280_s24 = smov 0   ;;  %s1282_s25 = smov 0  }
   0xd   :  { %s1284_s26 = smov 0   ;;  %s1286_s27 = smov 0  }
   0xe   :  { %s1288_s28 = smov 0   ;;  %s1290_s29 = smov 0  }
   0xf   :  { %s1292_s30 = smov 0   ;;  %s1294_s6 = smov 0  }
  0x10 LB: > { %1718 = sst [smem:[#allocation14_spill]] %s1183_s20  ;;  %s34_s7 = sadd.s32 1, %s1219_s29  ;;  %s1227_s6 = sphi %s1294_s6, %s22_s6   ;;  %s1223_s30 = sphi %s1292_s30, %s1769_s30   ;;  %s1219_s29 = sphi %s1290_s29, %s1768_s29   ;;  %s1215_s28 = sphi %s1288_s28, %s1767_s28   ;;  %s1211_s27 = sphi %s1286_s27, %s1766_s27   ;;  %s1207_s26 = sphi %s1284_s26, %s1765_s26   ;;  %s1203_s25 = sphi %s1282_s25, %s1775_s25   ;;  %s1199_s24 = sphi %s1280_s24, %s1774_s24   ;;  %s1195_s23 = sphi %s1278_s23, %s1763_s23   ;;  %s1191_s22 = sphi %s1276_s22, %s1773_s22   ;;  %s1187_s21 = sphi %s1274_s21, %s1772_s21   ;;  %s1183_s20 = sphi %s1272_s20, %s1761_s20   ;;  %s1179_s19 = sphi %s1270_s19, %s1771_s19   ;;  %s1175_s18 = sphi %s1268_s18, %s1770_s18  }
  0x11   : > { %1719 = sst [smem:[#allocation15_spill]] %s1195_s23  ;;  %s41_s8 = sadd.s32 1, %s1223_s30 }
  0x12   : > { %1720 = sst [smem:[#allocation16_spill]] %s1207_s26  ;;  %p35_p0 = scmp.ge.s32.totalorder %s34_s7, 2 }
  0x13   : > { %1721 = sst [smem:[#allocation17_spill]] %s1211_s27  ;;  %s50_s9 = sadd.s32 1, %s1207_s26 }
  0x14   : > { %1722 = sst [smem:[#allocation18_spill]] %s1215_s28  ;;  %p57_p1 = scmp.ne.s32.totalorder %s1207_s26, %s1203_s25 }
  0x15   : > { %1723 = sst [smem:[#allocation19_spill]] %s1219_s29  ;;  %p58_p2 = scmp.eq.s32.totalorder %s1227_s6, 0 }
  0x16   : > { %1724 = sst [smem:[#allocation20_spill]] %s1223_s30  ;;  %s1777_s7 = smov (%p35_p0, %s34_s7), 0 }
  0x17   : > { %1725 = sst [smem:[#allocation21_spill]] %s1777_s7  ;;  %s1779_s8 = smov (!%p35_p0, %s41_s8), %s1223_s30 }
  0x18   : > { %p1349_p3 = por %p58_p2, %p57_p1  ;;  %p43_p5 = scmp.ge.s32.totalorder %s1779_s8, 2 }
  0x19   : > { %s115_s11 = ssub.s32 %s1219_s29, %s1777_s7  ;;  %s118_s12 = sadd.s32 1, %s1195_s23 }
  0x1a   : > { %p116_p6 = scmp.eq.s32.totalorder %s115_s11, 0  ;;  %s1781_s8 = smov (%p43_p5, %s1779_s8), 0 }
  0x1b   : > { %1727 = sst [smem:[#allocation22_spill]] %s1781_s8  ;;  %s45_s14 = ssub.s32 %s1223_s30, %s1781_s8 }
  0x1c   : > { %s1361_s13 = scalar_select %p116_p6, %s1195_s23, %s118_s12  }
  0x1d   : > { %p125_p7 = scmp.ne.s32.totalorder %s1195_s23, %s1191_s22  ;;  %p48_p8 = scmp.eq.s32.totalorder %s45_s14, 0 }
  0x1e   : > { %1728 = sst [smem:[#allocation23_spill]] %s1361_s13  ;;  %s171_s16 = sor.u32 %s115_s11, %s45_s14 }
  0x1f   : > { %p1371_p10 = por %p125_p7, %p58_p2  ;;  %p172_p11 = scmp.eq.s32.totalorder %s171_s16, 0 }
  0x20   : > { %s1376_s17 = scalar_select %p48_p8, %s1207_s26, %s50_s9  }
  0x21   : > { %s174_s7 = sadd.s32 1, %s1183_s20  ;;  %p841_p12 = scmp.lt.s32.totalorder %s1227_s6, 4 }
  0x22   : > { %1730 = sst [smem:[#allocation24_spill]] %s1376_s17  ;;  %s227_s12 = sand.u32 1, %s1227_s6  }
  0x23   : > { %s1381_s5 = scalar_select %p172_p11, %s1183_s20, %s174_s7  }
  0x24   : > { %s229_s8 = sand.u32 1, %s1207_s26   ;;  %s757_s28 = sshll.u32 %s1223_s30, 5 }
  0x25   : > { %1731 = sst [smem:[#allocation25_spill]] %s1381_s5  ;;  %s756_s13 = sshll.u32 %s229_s8, 1 }
  0x26   : > { %s1732_s0 = sld [smem:[#allocation26_spill]]  ;;  %s231_s9 = scalar_lea.vmem [#allocation3], %s756_s13 }
  0x27   : > { %s239_s11 = sshll.u32 %s231_s9, 4  ;;  %p1395_p13 = pnand %p841_p12, %p1349_p3  ;;  %s1391_s11 = int_to_ptr.vmem [resolvable:$true] %s239_s11 }
  0x28   : > { %p1401_p0 = pnand %p841_p12, %p1371_p10  ;;  %s1405_s4 = scalar_lea.sflag [#allocation4], %s227_s12 }
  0x29   : > { %p987_p2 = pneg %p1395_p13 }
  0x2a   : > { %s1734_s2 = scalar_select %p1401_p0, 1, 0 }
  0x2c   : > { %s1389_s27 = scalar_lea.hbm %s1732_s0, %s757_s28  ;;  %s990_s13 = scalar_lea.hbm %s1732_s0, 64 }
  0x2d   : > { %s985_s28 = scalar_lea.hbm %s1389_s27, 32  ;;  %p991_p6 = scmp.lt.u32.totalorder %s1389_s27, %s1732_s0 }
  0x2e   : > { %p986_p1 = scmp.ne.s32.totalorder %s1389_s27, %s985_s28  ;;  %p992_p7 = scmp.lt.u32.totalorder %s990_s13, %s985_s28 }
  0x2f   : > { %p994_p10 = scmp.lt.u32.totalorder %s985_s28, %s1389_s27 }
  0x30   : > { %p988_p5 = pnand %p987_p2, %p986_p1  ;;  %p993_p8 = por %p992_p7, %p991_p6 }
  0x32   : > { %p989_p3 = pneg %p988_p5  ;;  %p995_p11 = por %p994_p10, %p993_p8 }
  0x34   : > { %p996_p12 = pnand %p995_p11, %p989_p3 }
  0x36   : > { %999 = shalt.err (!%p996_p12)
}
  0x37   : > { %s1000_s16 = scalar_lea.vmem %s1391_s11, 32  ;;  %s1229_s12 = smov [#allocation3]  }
  0x38   : > { %p1001_p1 = scmp.ne.s32.totalorder %s1391_s11, %s1000_s16  ;;  %s1005_s9 = sshll.u32 %s1229_s12, 4  ;;  %s1006_s9 = int_to_ptr.vmem [resolvable:$false] %s1005_s9 }
  0x39   : > { %s1007_s8 = scalar_lea.vmem %s1006_s9, 64  ;;  %p1008_p4 = scmp.lt.s32.totalorder %s1391_s11, %s1006_s9 }
  0x3a   : > { %p1003_p5 = pnand %p1001_p1, %p987_p2  ;;  %p1009_p6 = scmp.lt.s32.totalorder %s1007_s8, %s1000_s16 }
  0x3c   : > { %p1004_p9 = pneg %p1003_p5  ;;  %p1010_p7 = por %p1009_p6, %p1008_p4 }
  0x3e   : > { %p1011_p8 = pnand %p1010_p7, %p1004_p9 }
  0x40   : > { %1014 = shalt.err (!%p1011_p8)
}
  0x41   : > { %832 = dma.hbm_to_vmem [thread:$0]  (!%p1395_p13), %s1389_s27, 32, %s1391_s11, %s1405_s4  }
  0x42   : > { %s1434_s28 = sadd.s32 4294967295, %s1227_s6   ;;  %s752_s7 = sadd.s32 4294967294, %s1227_s6  }
  0x43   : > { %p1708_p4 = scmp.eq.s32.totalorder %s1434_s28, 0  ;;  %p184_p9 = scmp.ne.s32.totalorder %s1183_s20, %s1179_s19 }
  0x44   : > { %p185_p2 = scmp.eq.s32.totalorder %s1434_s28, 3  ;;  %p1735_p3 = scmp.ne.s32.totalorder %s1203_s25, %s1199_s24 }
  0x45   : > { %p1737_p13 = scmp.ne.s32.totalorder %s1191_s22, %s1187_s21  ;;  %p190_p1 = scmp.ne.s32.totalorder %s1179_s19, %s1175_s18 }
  0x46   : > { %p1446_p10 = por %p1708_p4, %p1735_p3  ;;  %p1459_p12 = por %p185_p2, %p184_p9 }
  0x47   : > { %p1455_p11 = por %p1737_p13, %p1708_p4  ;;  %p191_p5 = scmp.eq.s32.totalorder %s752_s7, 3 }
  0x48   : > { %s1736_s10 = scalar_select %p1446_p10, 1, 0 }
  0x49   : > { %s1738_s27 = scalar_select %p1455_p11, 1, 0 }
  0x4a   : > { %s1739_s11 = scalar_select %p1459_p12, 1, 0 }
  0x4b   : > { %p753_p6 = scmp.ge.s32.totalorder %s1227_s6, 1  ;;  %p198_p7 = scmp.lt.s32.totalorder %s1227_s6, 5 }
  0x4c   : > { %p1467_p8 = por %p191_p5, %p190_p1  ;;  %s1230_s21 = smov [#allocation6]  }
  0x4d   : > { %p1471_p3 = pnand %p753_p6, %p198_p7  ;;  %s210_s14 = sshll.u32 %s1230_s21, 4  ;;  %s1475_s14 = int_to_ptr.vmem [resolvable:$true] %s210_s14 }
  0x4e   : > { %s1740_s24 = scalar_select %p1467_p8, 1, 0 }
  0x4f   : > { %s1741_s13 = scalar_select %p1471_p3, 1, 0 }
  0x50   : > { %p825_p9 = pneg %p1471_p3  ;;  %s248_s15 = sand.u32 1, %s1195_s23  }
  0x51   : > { %s759_s16 = sshll.u32 %s1219_s29, 6  ;;  %s758_s9 = sshll.u32 %s248_s15, 7 }
  0x52   : > { %p1483_p2 = pnand %p825_p9, %p1708_p4  ;;  %s1490_s0 = scalar_lea.hbm %s1696_s3, %s759_s16 }
  0x53   : > { %s250_s30 = scalar_lea.vmem [#allocation8], %s758_s9  ;;  %s1015_s5 = scalar_lea.hbm %s1694_s1, 512 }
  0x54   : > { %s256_s21 = sshll.u32 %s250_s30, 4  ;;  %p1016_p13 = scmp.ne.s32.totalorder %s1694_s1, %s1015_s5  ;;  %s1515_s21 = int_to_ptr.vmem [resolvable:$true] %s256_s21 }
  0x55   : > { %p1017_p1 = pneg %p1483_p2  ;;  %p1022_p7 = scmp.lt.u32.totalorder %s1015_s5, %s1694_s1 }
  0x57   : > { %p1018_p5 = pnand %p1017_p1, %p1016_p13 }
  0x59   : > { %p1019_p6 = pneg %p1018_p5 }
  0x5b   : > { %p1024_p9 = pnand %p1022_p7, %p1019_p6 }
  0x5d   : > { %1027 = shalt.err (!%p1024_p9)
}
  0x5e   : > { %s1028_s30 = scalar_lea.vmem %s1475_s14, 512  ;;  %p1036_p11 = scmp.lt.s32.totalorder %s1475_s14, %s1475_s14 }
  0x5f   : > { %p1029_p4 = scmp.ne.s32.totalorder %s1475_s14, %s1028_s30  ;;  %p1037_p10 = scmp.lt.s32.totalorder %s1028_s30, %s1028_s30 }
  0x61   : > { %p1031_p8 = pnand %p1029_p4, %p1017_p1  ;;  %p1038_p3 = por %p1037_p10, %p1036_p11 }
  0x63   : > { %p1032_p12 = pneg %p1031_p8 }
  0x65   : > { %p1039_p0 = pnand %p1038_p3, %p1032_p12 }
  0x67   : > { %1042 = shalt.err (!%p1039_p0)
}
  0x68   : > { %s1231_s23 = smov 128   ;;  %s1232_s5 = smov 8  }
  0x69   : > { %828 = dma.hbm_to_vmem [thread:$0]  (!%p1483_p2), %s1694_s1, 512, %s1475_s14, [#allocation7], %s1231_s23, %s1231_s23, %s1232_s5  }
  0x6a   : > { %s1043_s29 = scalar_lea.hbm %s1490_s0, 2048  ;;  %p1743_p4 = scmp.ne.s32.totalorder %s1734_s2, 0 }
  0x6b   : > { %p1044_p0 = scmp.ne.s32.totalorder %s1490_s0, %s1043_s29  ;;  %s1048_s12 = scalar_lea.hbm %s1696_s3, 4096 }
  0x6c   : > { %p1045_p10 = pneg %p1743_p4  ;;  %p1049_p8 = scmp.lt.u32.totalorder %s1490_s0, %s1696_s3 }
  0x6d   : > { %p1050_p3 = scmp.lt.u32.totalorder %s1048_s12, %s1043_s29  ;;  %p1052_p13 = scmp.lt.u32.totalorder %s1043_s29, %s1490_s0 }
  0x6e   : > { %p1046_p11 = pnand %p1045_p10, %p1044_p0 }
  0x6f   : > { %p1051_p2 = por %p1050_p3, %p1049_p8 }
  0x70   : > { %p1047_p12 = pneg %p1046_p11 }
  0x71   : > { %p1053_p1 = por %p1052_p13, %p1051_p2 }
  0x73   : > { %p1054_p5 = pnand %p1053_p1, %p1047_p12 }
  0x75   : > { %1057 = shalt.err (!%p1054_p5)
}
  0x76   : > { %s1058_s14 = scalar_lea.vmem %s1515_s21, 2048  ;;  %s1233_s7 = smov [#allocation8]  }
  0x77   : > { %p1059_p6 = scmp.ne.s32.totalorder %s1515_s21, %s1058_s14  ;;  %s1063_s15 = sshll.u32 %s1233_s7, 4  ;;  %s1064_s15 = int_to_ptr.vmem [resolvable:$false] %s1063_s15 }
  0x78   : > { %s1065_s30 = scalar_lea.vmem %s1064_s15, 4096  ;;  %p1066_p0 = scmp.lt.s32.totalorder %s1515_s21, %s1064_s15 }
  0x79   : > { %p1061_p7 = pnand %p1059_p6, %p1045_p10  ;;  %p1067_p11 = scmp.lt.s32.totalorder %s1065_s30, %s1058_s14 }
  0x7b   : > { %p1062_p9 = pneg %p1061_p7  ;;  %p1068_p8 = por %p1067_p11, %p1066_p0 }
  0x7d   : > { %p1069_p3 = pnand %p1068_p8, %p1062_p9 }
  0x7f   : > { %1072 = shalt.err (!%p1069_p3)
}
  0x80   : > { %s1234_s5 = smov 64   ;;  %s1235_s20 = smov 4  }
  0x81   : > { %835 = dma.hbm_to_vmem [thread:$0]  (!%p1743_p4), %s1490_s0, 2048, %s1515_s21, %s1405_s4, %s1231_s23, %s1234_s5, %s1235_s20  }
  0x82   : > { %p1744_p10 = scmp.ne.s32.totalorder %s1741_s13, 0 }
  0x83   : > { %s276_s26 = sand.u32 (!%p1744_p10), 1, %s1434_s28   ;;  %s278_s29 = sand.u32 (!%p1744_p10), 1, %s1203_s25  }
  0x84   : > { %274 = sbr.rel (%p1744_p10) target bundleno = 646 (0x286), region = 40  ;;  %s1548_s17 = sshll.u32 (!%p1744_p10), %s278_s29, 1 }
  0x85   : > { %s277_s16 = scalar_lea.sflag (!%p1744_p10), [#allocation4], %s276_s26  ;;  %s280_s12 = scalar_lea.vmem (!%p1744_p10), [#allocation3], %s1548_s17 }
  0x86   : > { %p1745_p12 = scmp.ne.s32.totalorder (!%p1744_p10), %s1736_s10, 0 }
  0x8b   : > { %1158 = dma.done.wait (%p1745_p12), %s277_s16, 32  }
  0x8c   : > { %1160 = vsyncadd (%p1745_p12), %s277_s16, 4294967264  ;;  %p1746_p4 = scmp.eq.s32.totalorder %s1434_s28, 0 }
  0x8e   : > { %1162 = dma.done.wait (%p1746_p4), [#allocation7], 512   ;;  %p1747_p2 = pmov %p1746_p4 }
  0x8f   : > { %s291_s0 = sand.u32 1, %s1191_s22   ;;  %p1748_p13 = scmp.ne.s32.totalorder %s1738_s27, 0 }
  0x90   : > { %1164 = vsyncadd (%p1747_p2), [#allocation7], 4294966784  ;;  %s763_s2 = sshll.u32 %s291_s0, 7 }
  0x91   : > { %s1560_s4 = scalar_lea.vmem [#allocation8], %s763_s2 }
  0x92   : > { %1166 = dma.done.wait (%p1748_p13), %s277_s16, 2048  }
  0x93   : > { %1168 = vsyncadd (%p1748_p13), %s277_s16, 4294965248  ;;  %s1749_s10 = sld [smem:[#allocation17_spill]]  ;;  %s325_s13 = sand.u32 1, %s1179_s19  }
  0x94   : > { %s1570_s28 = sshll.u32 %s325_s13, 2  ;;  %s1750_s8 = sld [smem:[#allocation28_spill]] }
  0x95   : > { %s327_s7 = scalar_lea.vmem [#allocation9], %s1570_s28 }
  0x99   : > { %p328_p1 = scmp.lt.s32.totalorder %s1749_s10, 1  ;;  %p765_p5 = scmp.ne.s32.totalorder %s1749_s10, 0 }
  0x9a   : > { %v962_v0 = vld [vmem:[#allocation6 + $0x4] ss:$8 sps:$4 sm:$0xff] (!%p765_p5)   ;;  %v964_v1 = vld [vmem:[#allocation6] ss:$8 sps:$4 sm:$0xff] (!%p765_p5)   ;;  %v1236_v2 = vmov (!%p765_p5), 0   ;;  %vm373_vm0 = vcmask (!%p765_p5), 261120   ;;  %v343_v6 = vlaneseq (!%p765_p5) }
  0x9b   : > { %s1573_s21 = scalar_select %p328_p1, %s1749_s10, 1 }
  0x9c   : > { %335 = sbr.rel (%p765_p5) target bundleno = 382 (0x17e), region = 56  ;;  %409 = vmatprep.mubr.bf16.mxu0 (!%p765_p5), %v1236_v2  ;;  %377 = vmatprep.subr.bf16.mxu0 (!%p765_p5), %v962_v0  ;;  %v965_v3 = vld [vmem:[#allocation6 + $0x14] ss:$8 sps:$4 sm:$0xff] (!%p765_p5)   ;;  %v967_v4 = vld [vmem:[#allocation6 + $0x10] ss:$8 sps:$4 sm:$0xff] (!%p765_p5)   ;;  %v344_v7 = vshrl.u32 (!%p765_p5), %v343_v6, 7 }
  0x9d   : > { %s330_s14 = scalar_lea.vmem %s1750_s8, %s1573_s21  ;;  %378 = vmatpush1.bf16.msra.mxu0 (!%p765_p5), %v964_v1  ;;  %v336_v5 = vld [vmem:[%s280_s12] sm:$0x3] (!%p765_p5)  ;;  %s1751_s30 = sld [smem:[#allocation27_spill]] (!%p765_p5) }
  0x9e   : > { %379 = vmatprep.subr.bf16.mxu0 (!%p765_p5), %v965_v3  ;;  %v345_v8 = vsub.s32 (!%p765_p5), 0, %v344_v7  ;;  %v349_v10 = vsub.s32 (!%p765_p5), 1, %v344_v7 }
  0xa1   : > { %380 = vmatpush1.bf16.msra.mxu0 (!%p765_p5), %v967_v4 }
  0xa3   : > { %v341_v9 = vld [vmem:[%s1751_s30] sm:$0x3] }
  0xa4   : > { %770 = vmatmul.mubr.msk.bf16.vlgmr.msra.gmra.mrb[0].mxu0 %vm373_vm0, %v336_v5  ;;  %v346_v11 = vrot.slane %v341_v9, %v345_v8  ;;  %v350_v12 = vrot.slane %v341_v9, %v349_v10 }
 0x177   : > { %v411_v13 = vpop.f32.mrb[0].mxu0 }
 0x178   : > { %v412_v14 = vadd.f32 %v411_v13, %v346_v11  ;;  %v413_v15 = vpop.f32.mrb[1].mxu0 }
 0x179   : > { %v414_v16 = vadd.f32 %v413_v15, %v350_v12  ;;  %v415_v17 = vpop.f32.mrb[2].mxu0 }
 0x17a   : > { %v416_v18 = vpop.f32.mrb[3].mxu0 }
 0x17b   : > { %v420_v19 = vcombine.low %v412_v14, %v414_v16 }
 0x17d   : > { %422 = vst [vmem:[#allocation2] sm:$0xff] %v420_v19 }
 0x17e PF: > { %v968_v20 = vld [vmem:[%s1560_s4 + $0x40] sm:$0xff]   ;;  %v970_v22 = vld [vmem:[%s1560_s4 + $0x48] sm:$0xff]   ;;  %v972_v24 = vld [vmem:[%s1560_s4 + $0x50] sm:$0xff]   ;;  %s1752_s5 = sld [smem:[#allocation18_spill]]  ;;  %s1753_s20 = sld [smem:[#allocation17_spill]] }
 0x17f   : > { %v969_v21 = vld [vmem:[%s1560_s4] sm:$0xff]   ;;  %793 = vmatprep.subr.bf16.mxu0 %v968_v20  ;;  %v971_v23 = vld [vmem:[%s1560_s4 + $0x8] sm:$0xff]   ;;  %v973_v25 = vld [vmem:[%s1560_s4 + $0x10] sm:$0xff]   ;;  %s623_s2 = sshll.u32 %s327_s7, 4  ;;  %s1755_s23 = sld [smem:[#allocation29_spill]]  ;;  %s1614_s2 = int_to_ptr.vmem [resolvable:$true] %s623_s2 }
 0x180   : > { %794 = vmatpush3.bf16.msra.mxu0 %v969_v21  ;;  %v974_v26 = vld [vmem:[%s1560_s4 + $0x58] sm:$0xff]   ;;  %v976_v28 = vld [vmem:[%s1560_s4 + $0x60] sm:$0xff]   ;;  %v978_v30 = vld [vmem:[%s1560_s4 + $0x68] sm:$0xff]   ;;  %s606_s21 = scalar_lea.sflag [#allocation5], %s325_s13  ;;  %p1757_p7 = scmp.ne.s32.totalorder %s1739_s11, 0 }
 0x181   : > { %795 = vmatprep.subr.bf16.mxu0 %v970_v22  ;;  %v975_v27 = vld [vmem:[%s1560_s4 + $0x18] sm:$0xff]   ;;  %v977_v29 = vld [vmem:[%s1560_s4 + $0x20] sm:$0xff]   ;;  %v979_v33 = vld [vmem:[%s1560_s4 + $0x28] sm:$0xff]   ;;  %s1237_s27 = smov [#allocation9]  }
 0x182   : > { %v980_v35 = vld [vmem:[%s1560_s4 + $0x70] sm:$0xff]   ;;  %v982_v37 = vld [vmem:[%s1560_s4 + $0x78] sm:$0xff]   ;;  %s1077_s15 = sshll.u32 %s1237_s27, 4  ;;  %s1078_s15 = int_to_ptr.vmem [resolvable:$false] %s1077_s15 }
 0x183   : > { %v981_v36 = vld [vmem:[%s1560_s4 + $0x30] sm:$0xff]   ;;  %v983_v38 = vld [vmem:[%s1560_s4 + $0x38] sm:$0xff]   ;;  %s1079_s30 = scalar_lea.vmem %s1078_s15, 128  ;;  %p1080_p11 = scmp.lt.s32.totalorder %s1614_s2, %s1078_s15 }
 0x184   : > { %796 = vmatpush3.bf16.msra.mxu0 %v971_v23  ;;  %v423_v31 = vld [vmem:[#allocation2] sm:$0xff]  ;;  %s789_s26 = sshll.u32 %s1752_s5, 1 }
 0x185   : > { %797 = vmatprep.subr.bf16.mxu0 %v972_v24  ;;  %v425_v32 = vcombine.high %v423_v31, %v423_v31  ;;  %v427_v39 = vpack.c.bf16 %v423_v31, %v423_v31  ;;  %s619_s29 = sadd.s32 %s1753_s20, %s789_s26  ;;  %v771_v41 = vld [vmem:[%s330_s14] ss:$0 sm:$0xff]  ;;  %s1756_s9 = smov %s1755_s23 }
 0x186   : > { %s790_s0 = sshll.u32 %s619_s29, 6  ;;  %s1073_s14 = scalar_lea.vmem %s1614_s2, 64 }
 0x187   : > { %v428_v34 = vpack.c.bf16 %v425_v32, %v425_v32  ;;  %s1612_s8 = scalar_lea.hbm %s1755_s23, %s790_s0  ;;  %p1074_p6 = scmp.ne.s32.totalorder %s1614_s2, %s1073_s14 }
 0x188   : > { %798 = vmatpush3.bf16.msra.mxu0 %v973_v25  ;;  %p1081_p8 = scmp.lt.s32.totalorder %s1079_s30, %s1073_s14 }
 0x189   : > { %799 = vmatprep.subr.bf16.mxu0 %v974_v26  ;;  %596 = vmatprep.mubr.bf16.mxu0 %v428_v34  ;;  %p1075_p9 = pnand %p1074_p6, %p1757_p7 }
 0x18a   : > { %p1082_p3 = por %p1081_p8, %p1080_p11 }
 0x18b   : > { %p1076_p0 = pneg %p1075_p9 }
 0x18c   : > { %800 = vmatpush3.bf16.msra.mxu0 %v975_v27 }
 0x18d   : > { %801 = vmatprep.subr.bf16.mxu0 %v976_v28  ;;  %p1083_p10 = pnand %p1082_p3, %p1076_p0 }
 0x190   : > { %802 = vmatpush3.bf16.msra.mxu0 %v977_v29 }
 0x191   : > { %803 = vmatprep.subr.bf16.mxu0 %v978_v30 }
 0x194   : > { %804 = vmatpush3.bf16.msra.mxu0 %v979_v33 }
 0x195   : > { %805 = vmatprep.subr.bf16.mxu0 %v980_v35 }
 0x198   : > { %806 = vmatpush3.bf16.msra.mxu0 %v981_v36 }
 0x199   : > { %807 = vmatprep.subr.bf16.mxu0 %v982_v37 }
 0x19c   : > { %808 = vmatpush3.bf16.msra.mxu0 %v983_v38 }
 0x19f   : > { %597 = vmatmul.mubr.bf16.vlgmr.msra.gmra.mrb[0].mxu0 %v427_v39 }
 0x272   : > { %v809_v40 = vpop.f32.mrb[0].mxu0 }
 0x273   : > { %v810_v42 = vpop.f32.mrb[1].mxu0 }
 0x274   : > { %v811_v43 = vadd.f32 %v810_v42, %v809_v40  ;;  %v812_v44 = vpop.f32.mrb[2].mxu0 }
 0x275   : > { %v813_v45 = vpop.f32.mrb[3].mxu0 }
 0x276   : > { %v599_v46 = vadd.f32 %v811_v43, %v771_v41 }
 0x278   : > { %604 = vst [vmem:[%s327_s7] sm:$0xf] %v599_v46 }
 0x279   : > { %1086 = shalt.err (!%p1083_p10)
}
 0x27a   : > { %s1087_s13 = scalar_lea.hbm %s1612_s8, 64  ;;  %s1091_s5 = scalar_lea.hbm %s1756_s9, 256 }
 0x27b   : > { %p1088_p12 = scmp.ne.s32.totalorder %s1612_s8, %s1087_s13  ;;  %p1092_p13 = scmp.lt.u32.totalorder %s1612_s8, %s1756_s9 }
 0x27c   : > { %p1093_p1 = scmp.lt.u32.totalorder %s1091_s5, %s1087_s13  ;;  %p1095_p6 = scmp.lt.u32.totalorder %s1087_s13, %s1612_s8 }
 0x27d   : > { %p1089_p4 = pnand %p1088_p12, %p1757_p7 }
 0x27e   : > { %p1094_p5 = por %p1093_p1, %p1092_p13 }
 0x27f   : > { %p1090_p2 = pneg %p1089_p4 }
 0x280   : > { %p1096_p9 = por %p1095_p6, %p1094_p5 }
 0x282   : > { %p1097_p0 = pnand %p1096_p9, %p1090_p2 }
 0x284   : > { %1100 = shalt.err (!%p1097_p0)
}
 0x285   : > { %823 = dma.vmem_to_hbm [thread:$0]  (%p1757_p7), %s1614_s2, 64, %s1612_s8, %s606_s21  }
 0x286 PF: > { %p843_p11 = scmp.ge.s32.totalorder %s1227_s6, 2  ;;  %s635_s29 = sand.u32 1, %s1175_s18  }
 0x287   : > { %p1758_p8 = scmp.ne.s32.totalorder %s1740_s24, 0  ;;  %s636_s17 = scalar_lea.sflag [#allocation5], %s635_s29 }
 0x289   : > { %p837_p3 = pnand %p843_p11, %p1758_p8 }
 0x28b   : > { %1170 = dma.done.wait (!%p837_p3), %s636_s17, 64  }
 0x28c   : > { %1172 = vsyncadd (!%p837_p3), %s636_s17, 4294967232  ;;  %s22_s6 = sadd.s32 1, %s1227_s6   ;;  %s1760_s11 = sld [smem:[#allocation14_spill]] }
 0x28d   : > { %p1646_p10 = scmp.ge.s32.totalorder %s22_s6, 6   ;;  %s1761_s20 = sld [smem:[#allocation25_spill]] }
 0x28e   : > { %s1762_s12 = sld [smem:[#allocation15_spill]]  ;;  %s1763_s23 = sld [smem:[#allocation23_spill]] }
 0x28f   : > { %s1764_s0 = sld [smem:[#allocation16_spill]]  ;;  %s1765_s26 = sld [smem:[#allocation24_spill]] }
 0x290   : > { %s1766_s27 = sld [smem:[#allocation19_spill]]  ;;  %s1767_s28 = sld [smem:[#allocation20_spill]] }
 0x291   : > { %s1768_s29 = sld [smem:[#allocation21_spill]]  ;;  %s1769_s30 = sld [smem:[#allocation22_spill]] }
 0x292   : > { %s1770_s18 = smov %s1179_s19  ;;  %s1771_s19 = smov %s1760_s11 }
 0x293   : > { %s1772_s21 = smov %s1191_s22  ;;  %s1774_s24 = smov %s1203_s25 }
 0x294   : > { %s1773_s22 = smov %s1762_s12  ;;  %21 = sbr.rel (!%p1646_p10) target bundleno = 16 (0x10), region = 107 }
 0x295   : > { %s1775_s25 = smov %s1764_s0 }
 0x29b   :  { %641 = vsyncpa [#allocation4], 1 }
 0x29c   :  { %643 = vsyncpa [#allocation4 + $0x1], 1 }
 0x29d   :  { %644 = vsyncpa [#allocation7], 1 }
 0x29e   :  { %645 = vsyncpa [#allocation5], 1 }
 0x29f   :  { %647 = vsyncpa [#allocation5 + $0x1], 1 }

</bundles_post_ra>
